<compile_context>
chip_gen: v7x
topology: tpu7x:2x2x1
jax: 0.10.0
libtpu: 0.0.40
codegen_flags: <defaults>
</compile_context>

<pallas_src>
import functools

import jax
import jax.numpy as jnp
import numpy as np
from jax import lax
from jax.experimental import pallas as pl
from jax.experimental.pallas import tpu as pltpu


def _round_up(x, m):
    return ((x + m - 1) // m) * m


def _sigmoid1(z):
    # sigmoid(z) = 0.5*(tanh(0.5*z) + 1): one EUP push instead of exp + reciprocal.
    return 0.5 * jnp.tanh(0.5 * z) + 0.5


def _lstm_block_kernel(x_ref, h0_ref, c0_ref, wx_ref, wh_ref, b_ref,
                       hseq_ref, cseq_ref,
                       gx_scr, h_scr, c_scr,
                       *, tb, bb, d, hp, compute_dtype, unroll):
    """One (batch-tile, time-block) grid step of the LSTM rollout.

    x_ref    : (Tb, Bb, D)          time-major raw inputs for this block
    h0/c0    : (Bb, Hp)  f32        initial state (consumed only at time block 0)
    wx_ref   : (D, 4*Hp)            input weights, gate-aligned, resident
    wh_ref   : (Hp, 4*Hp)           recurrent weights, gate-aligned, resident
    b_ref    : (1, 4*Hp) f32        bias
    hseq/cseq: (Tb, Bb, Hp)         per-step outputs
    gx_scr   : (Tb*Bb, 4*Hp) f32    block-level input projection (off serial path)
    h_scr/c_scr : (Bb, Hp) f32      autoregressive carry across time blocks
    """
    # Initialize the autoregressive carry at the first time block of each batch tile.
    @pl.when(pl.program_id(1) == 0)
    def _():
        h_scr[...] = h0_ref[...]
        c_scr[...] = c0_ref[...]

    # Time-parallel input projection for the whole block: one MXU matmul that is NOT
    # on the h-dependence chain.  Replaces the previous (Tp,Bp,4Hp) HBM intermediate
    # with a VMEM scratch (no HBM round trip for the gates stream).
    x_blk = x_ref[...].reshape(tb * bb, d).astype(compute_dtype)
    gx_scr[...] = (jnp.dot(x_blk, wx_ref[...], preferred_element_type=jnp.float32)
                   + b_ref[...])

    def step(i, carry):
        h, c = carry  # f32 (Bb, Hp), carried in vregs
        off = pl.multiple_of(i * bb, bb)
        # Recurrent matmul: Wh is referenced from VMEM inside the loop (never hoisted
        # into vregs), so the register file stays free for h/c/gates.
        gates = gx_scr[pl.ds(off, bb), :] + jnp.dot(
            h.astype(compute_dtype), wh_ref[...],
            preferred_element_type=jnp.float32)
        # Lane-aligned gate tiles: each gate occupies its own Hp(=128)-wide slab.
        i_g = _sigmoid1(gates[:, 0 * hp:1 * hp])
        f_g = _sigmoid1(gates[:, 1 * hp:2 * hp])
        g_g = jnp.tanh(gates[:, 2 * hp:3 * hp])
        o_g = _sigmoid1(gates[:, 3 * hp:4 * hp])
        c_new = f_g * c + i_g * g_g
        h_new = o_g * jnp.tanh(c_new)
        # Lane-dense (Hp-wide) stores into the time-blocked output tiles.
        hseq_ref[i] = h_new.astype(hseq_ref.dtype)
        cseq_ref[i] = c_new.astype(cseq_ref.dtype)
        return h_new, c_new

    h, c = lax.fori_loop(0, tb, step, (h_scr[...], c_scr[...]), unroll=unroll)

    # Persist the carry for the next time block.
    h_scr[...] = h
    c_scr[...] = c


@functools.partial(jax.jit, static_argnames=("compute_dtype", "time_block",
                                             "batch_block", "time_major_output"))
def custom_lstm_rollout(x_btd, h0, c0, wx, wh, b, *,
                        compute_dtype=jnp.float32, time_block=32,
                        batch_block=None, time_major_output=False):
    """x_btd: [B,T,D]; h0/c0: [B,H]; wx: [D,4H]; wh: [H,4H]; b: [1,4H] (gate order i,f,g,o).

    Returns (h_seq[B,T,H], c_seq[B,T,H]) -- equivalent to CustomLSTM.forward with an
    LSTM cell and length = T.  With time_major_output=True returns [T,B,H] (skips the
    final transpose).  batch_block (multiple of 8) splits the parallel batch axis
    into several independent tiles (use ~Bp/2 on v7x so both TensorCores are busy).
    """
    B, T, D = x_btd.shape
    H = h0.shape[-1]
    G = 4
    f32 = jnp.float32

    Hp = _round_up(H, 128)                 # lane-aligned: each gate owns a 128-wide tile
    Tb = max(1, min(int(time_block), T))   # time block (amortizes per-grid-step overhead)
    Tp = _round_up(T, Tb)
    Bb = _round_up(B, 8) if batch_block is None else _round_up(int(batch_block), 8)
    Bp = _round_up(_round_up(B, 8), Bb)    # padded batch, multiple of the batch tile

    # --- gate-aligned weight repack: gate g lives in lanes [g*Hp, (g+1)*Hp) ----------
    wx_p = (jnp.zeros((D, G, Hp), f32).at[:, :, :H]
            .set(wx.astype(f32).reshape(D, G, H)).reshape(D, G * Hp)
            .astype(compute_dtype))
    wh_p = (jnp.zeros((Hp, G, Hp), f32).at[:H, :, :H]
            .set(wh.astype(f32).reshape(H, G, H)).reshape(Hp, G * Hp)
            .astype(compute_dtype))
    b_p = (jnp.zeros((G, Hp), f32).at[:, :H]
           .set(b.astype(f32).reshape(G, H)).reshape(1, G * Hp))

    # --- time-major, padded inputs (D << 4*Hp, so this is the cheap stream) ----------
    x_p = (jnp.zeros((Tp, Bp, D), compute_dtype)
           .at[:T, :B, :].set(jnp.transpose(x_btd, (1, 0, 2)).astype(compute_dtype)))
    h0_p = jnp.zeros((Bp, Hp), f32).at[:B, :H].set(h0.astype(f32))
    c0_p = jnp.zeros((Bp, Hp), f32).at[:B, :H].set(c0.astype(f32))

    out_dtype = x_btd.dtype
    unroll = True if Tb <= 16 else 4       # avoid code blowup / spills at large Tb

    kernel = functools.partial(_lstm_block_kernel, tb=Tb, bb=Bb, d=D, hp=Hp,
                               compute_dtype=compute_dtype, unroll=unroll)

    # --- explicit VMEM budget: double-buffered ins/outs + resident weights + scratch -
    def isz(dt):
        return jnp.dtype(dt).itemsize
    budget = (2 * Tb * Bb * D * isz(compute_dtype)          # x blocks
              + 2 * 2 * Tb * Bb * Hp * isz(out_dtype)       # h_seq / c_seq blocks
              + 2 * (D + Hp) * G * Hp * isz(compute_dtype)  # Wx, Wh (resident)
              + 2 * G * Hp * 4                              # bias
              + 2 * 2 * Bb * Hp * 4                         # h0 / c0
              + Tb * Bb * G * Hp * 4                        # gx scratch
              + 2 * Bb * Hp * 4)                            # h/c carries
    vmem_limit = int(min(max(budget * 3 // 2 + (2 << 20), 8 << 20), 96 << 20))

    h_seq_p, c_seq_p = pl.pallas_call(
        kernel,
        out_shape=(jax.ShapeDtypeStruct((Tp, Bp, Hp), out_dtype),
                   jax.ShapeDtypeStruct((Tp, Bp, Hp), out_dtype)),
        grid_spec=pltpu.PrefetchScalarGridSpec(
            num_scalar_prefetch=0,
            grid=(Bp // Bb, Tp // Tb),                       # (batch tiles, time blocks)
            in_specs=[
                pl.BlockSpec((Tb, Bb, D), lambda bi, ti: (ti, bi, 0)),   # x (time-major)
                pl.BlockSpec((Bb, Hp), lambda bi, ti: (bi, 0)),          # h0
                pl.BlockSpec((Bb, Hp), lambda bi, ti: (bi, 0)),          # c0
                pl.BlockSpec((D, G * Hp), lambda bi, ti: (0, 0)),        # Wx (resident)
                pl.BlockSpec((Hp, G * Hp), lambda bi, ti: (0, 0)),       # Wh (resident)
                pl.BlockSpec((1, G * Hp), lambda bi, ti: (0, 0)),        # bias
            ],
            out_specs=[
                pl.BlockSpec((Tb, Bb, Hp), lambda bi, ti: (ti, bi, 0)),
                pl.BlockSpec((Tb, Bb, Hp), lambda bi, ti: (ti, bi, 0)),
            ],
            scratch_shapes=[
                pltpu.VMEM((Tb * Bb, G * Hp), jnp.float32),  # block input projection
                pltpu.VMEM((Bb, Hp), jnp.float32),           # hidden-state carry (f32)
                pltpu.VMEM((Bb, Hp), jnp.float32),           # cell-state carry (f32)
            ],
        ),
        compiler_params=pltpu.CompilerParams(
            # batch tiles are independent (megacore-shardable); time is a recurrence.
            dimension_semantics=("parallel", "arbitrary"),
            vmem_limit_bytes=vmem_limit,
        ),
    )(x_p, h0_p, c0_p, wx_p, wh_p, b_p)

    if time_major_output:
        return h_seq_p[:T, :B, :H], c_seq_p[:T, :B, :H]
    # Unpad + back to the PyTorch [B, T, H] convention (fused under jit).
    h_seq = jnp.transpose(h_seq_p[:T, :B, :H], (1, 0, 2))
    c_seq = jnp.transpose(c_seq_p[:T, :B, :H], (1, 0, 2))
    return h_seq, c_seq


def _reference_rollout(x_btd, h0, c0, wx, wh, b):
    """Pure-JAX reference mirroring CustomLSTM.forward with an LSTM cell."""
    def step(carry, x_t):
        h, c = carry
        gates = x_t @ wx + h @ wh + b
        H = h.shape[-1]
        i = jax.nn.sigmoid(gates[:, 0 * H:1 * H])
        f = jax.nn.sigmoid(gates[:, 1 * H:2 * H])
        g = jnp.tanh(gates[:, 2 * H:3 * H])
        o = jax.nn.sigmoid(gates[:, 3 * H:4 * H])
        c_new = f * c + i * g
        h_new = o * jnp.tanh(c_new)
        return (h_new, c_new), (h_new, c_new)

    x_tbd = jnp.transpose(x_btd, (1, 0, 2))
    _, (h_seq, c_seq) = jax.lax.scan(step, (h0, c0), x_tbd)
    return jnp.transpose(h_seq, (1, 0, 2)), jnp.transpose(c_seq, (1, 0, 2))


if __name__ == "__main__":
    B, T, D, H = 2, 8, 16, 32

    key = jax.random.PRNGKey(0)
    k_x, k_h, k_c, k_wx, k_wh, k_b = jax.random.split(key, 6)

    x = jax.random.normal(k_x, (B, T, D), dtype=jnp.float32)
    h0 = jax.random.normal(k_h, (B, H), dtype=jnp.float32)
    c0 = jax.random.normal(k_c, (B, H), dtype=jnp.float32)
    # Deterministic LSTM-cell parameters (gate order: i, f, g, o).
    wx = jax.random.normal(k_wx, (D, 4 * H), dtype=jnp.float32) * 0.1
    wh = jax.random.normal(k_wh, (H, 4 * H), dtype=jnp.float32) * 0.1
    b = jax.random.normal(k_b, (1, 4 * H), dtype=jnp.float32) * 0.1

    h_ref, c_ref = _reference_rollout(x, h0, c0, wx, wh, b)

    # Config A: two time blocks of 4 -> exercises the autoregressive scratch carry
    # across grid steps.
    h_a, c_a = custom_lstm_rollout(x, h0, c0, wx, wh, b, time_block=4)
    jax.block_until_ready((h_a, c_a))
    np.testing.assert_allclose(np.asarray(h_a), np.asarray(h_ref), rtol=2e-5, atol=2e-5)
    np.testing.assert_allclose(np.asarray(c_a), np.asarray(c_ref), rtol=2e-5, atol=2e-5)

    # Config B: default time_block (clamped to T -> a single time block).
    h_b, c_b = custom_lstm_rollout(x, h0, c0, wx, wh, b)
    jax.block_until_ready((h_b, c_b))
    np.testing.assert_allclose(np.asarray(h_b), np.asarray(h_ref), rtol=2e-5, atol=2e-5)
    np.testing.assert_allclose(np.asarray(c_b), np.asarray(c_ref), rtol=2e-5, atol=2e-5)

    print("KERNEL_OK")
</pallas_src>

<mosaic_0001>
module attributes {stable_mosaic.version = 11 : i64} {
  func.func @_lstm_block_kernel(%arg0: i32, %arg1: i32, %arg2: memref<4x8x16xf32, #tpu.memory_space<vmem>>, %arg3: memref<8x128xf32, #tpu.memory_space<vmem>>, %arg4: memref<8x128xf32, #tpu.memory_space<vmem>>, %arg5: memref<16x512xf32, #tpu.memory_space<vmem>>, %arg6: memref<128x512xf32, #tpu.memory_space<vmem>>, %arg7: memref<1x512xf32, #tpu.memory_space<vmem>>, %arg8: memref<4x8x128xf32, #tpu.memory_space<vmem>>, %arg9: memref<4x8x128xf32, #tpu.memory_space<vmem>>, %arg10: memref<32x512xf32, #tpu.memory_space<vmem>>, %arg11: memref<8x128xf32, #tpu.memory_space<vmem>>, %arg12: memref<8x128xf32, #tpu.memory_space<vmem>>) attributes {dimension_semantics = [#tpu.dimension_semantics<parallel>, #tpu.dimension_semantics<arbitrary>], iteration_bounds = array<i64: 1, 2>, scalar_prefetch = 0 : i64, scratch_operands = 3 : i64, tpu.core_type = #tpu.core_type<tc>, window_params = [{transform_indices = @transform_0, window_bounds = array<i64: 4, 8, 16>}, {transform_indices = @transform_1, window_bounds = array<i64: 8, 128>}, {transform_indices = @transform_2, window_bounds = array<i64: 8, 128>}, {pipeline_mode = #tpu.pipeline_mode<synchronous>, transform_indices = @transform_3, window_bounds = array<i64: 16, 512>}, {pipeline_mode = #tpu.pipeline_mode<synchronous>, transform_indices = @transform_4, window_bounds = array<i64: 128, 512>}, {pipeline_mode = #tpu.pipeline_mode<synchronous>, transform_indices = @transform_5, window_bounds = array<i64: 1, 512>}, {transform_indices = @transform_6, window_bounds = array<i64: 4, 8, 128>}, {transform_indices = @transform_7, window_bounds = array<i64: 4, 8, 128>}]} {
    %c0_i32 = arith.constant 0 : i32
    %0 = arith.cmpi eq, %arg1, %c0_i32 : i32
    %1 = arith.extui %0 : i1 to i32
    %c0_i32_0 = arith.constant 0 : i32
    %2 = arith.cmpi ne, %1, %c0_i32_0 : i32
    scf.if %2 {
      %c0_89 = arith.constant 0 : index
      %c0_90 = arith.constant 0 : index
      %199 = vector.load %arg3[%c0_89, %c0_90] : memref<8x128xf32, #tpu.memory_space<vmem>>, vector<8x128xf32>
      %c0_91 = arith.constant 0 : index
      %c0_92 = arith.constant 0 : index
      %200 = vector.load %arg11[%c0_91, %c0_92] : memref<8x128xf32, #tpu.memory_space<vmem>>, vector<8x128xf32>
      tpu.vector_store %arg11[%c0_91, %c0_92], %199 {strides = array<i32>} : memref<8x128xf32, #tpu.memory_space<vmem>>, vector<8x128xf32>,
      %c0_93 = arith.constant 0 : index
      %c0_94 = arith.constant 0 : index
      %201 = vector.load %arg4[%c0_93, %c0_94] : memref<8x128xf32, #tpu.memory_space<vmem>>, vector<8x128xf32>
      %c0_95 = arith.constant 0 : index
      %c0_96 = arith.constant 0 : index
      %202 = vector.load %arg12[%c0_95, %c0_96] : memref<8x128xf32, #tpu.memory_space<vmem>>, vector<8x128xf32>
      tpu.vector_store %arg12[%c0_95, %c0_96], %201 {strides = array<i32>} : memref<8x128xf32, #tpu.memory_space<vmem>>, vector<8x128xf32>,
    } else {
    }
    %c0 = arith.constant 0 : index
    %c0_1 = arith.constant 0 : index
    %c0_2 = arith.constant 0 : index
    %3 = vector.load %arg2[%c0, %c0_1, %c0_2] : memref<4x8x16xf32, #tpu.memory_space<vmem>>, vector<4x8x16xf32>
    %4 = vector.shape_cast %3 : vector<4x8x16xf32> to vector<32x16xf32>
    %c0_3 = arith.constant 0 : index
    %c0_4 = arith.constant 0 : index
    %5 = vector.load %arg5[%c0_3, %c0_4] : memref<16x512xf32, #tpu.memory_space<vmem>>, vector<16x512xf32>
    %cst = arith.constant dense<0.000000e+00> : vector<32x512xf32>
    %6 = tpu.matmul %4, %5, %cst {dimension_numbers = #tpu.dot_dimension_numbers<[1], [0], [0], [1], [0, 0, 1, 1], [], []>} : vector<32x16xf32>, vector<16x512xf32>, vector<32x512xf32> -> vector<32x512xf32>
    %c0_5 = arith.constant 0 : index
    %c0_6 = arith.constant 0 : index
    %7 = vector.load %arg7[%c0_5, %c0_6] : memref<1x512xf32, #tpu.memory_space<vmem>>, vector<1x512xf32>
    %8 = vector.broadcast %7 : vector<1x512xf32> to vector<32x512xf32>
    %9 = arith.addf %6, %8 : vector<32x512xf32>
    %c0_7 = arith.constant 0 : index
    %c0_8 = arith.constant 0 : index
    %10 = vector.load %arg10[%c0_7, %c0_8] : memref<32x512xf32, #tpu.memory_space<vmem>>, vector<32x512xf32>
    tpu.vector_store %arg10[%c0_7, %c0_8], %9 {strides = array<i32>} : memref<32x512xf32, #tpu.memory_space<vmem>>, vector<32x512xf32>,
    %c0_9 = arith.constant 0 : index
    %c0_10 = arith.constant 0 : index
    %11 = vector.load %arg11[%c0_9, %c0_10] : memref<8x128xf32, #tpu.memory_space<vmem>>, vector<8x128xf32>
    %c0_11 = arith.constant 0 : index
    %c0_12 = arith.constant 0 : index
    %12 = vector.load %arg12[%c0_11, %c0_12] : memref<8x128xf32, #tpu.memory_space<vmem>>, vector<8x128xf32>
    %c0_i32_13 = arith.constant 0 : i32
    %c8_i32 = arith.constant 8 : i32
    %13 = arith.muli %c0_i32_13, %c8_i32 : i32
    %14 = tpu.assume_multiple %13, 8 : i32
    %15 = arith.index_cast %14 : i32 to index
    %c0_14 = arith.constant 0 : index
    %16 = vector.load %arg10[%15, %c0_14] : memref<32x512xf32, #tpu.memory_space<vmem>>, vector<8x512xf32>
    %c0_15 = arith.constant 0 : index
    %c0_16 = arith.constant 0 : index
    %17 = vector.load %arg6[%c0_15, %c0_16] : memref<128x512xf32, #tpu.memory_space<vmem>>, vector<128x512xf32>
    %cst_17 = arith.constant dense<0.000000e+00> : vector<8x512xf32>
    %18 = tpu.matmul %11, %17, %cst_17 {dimension_numbers = #tpu.dot_dimension_numbers<[1], [0], [0], [1], [0, 0, 1, 1], [], []>} : vector<8x128xf32>, vector<128x512xf32>, vector<8x512xf32> -> vector<8x512xf32>
    %19 = arith.addf %16, %18 : vector<8x512xf32>
    %20 = vector.extract_strided_slice %19 {offsets = [0, 0], sizes = [8, 128], strides = [1, 1]} : vector<8x512xf32> to vector<8x128xf32>
    %cst_18 = arith.constant 5.000000e-01 : f32
    %21 = vector.broadcast %cst_18 : f32 to vector<8x128xf32>
    %22 = arith.mulf %21, %20 : vector<8x128xf32>
    %23 = math.tanh %22 : vector<8x128xf32>
    %cst_19 = arith.constant 5.000000e-01 : f32
    %24 = vector.broadcast %cst_19 : f32 to vector<8x128xf32>
    %25 = arith.mulf %24, %23 : vector<8x128xf32>
    %cst_20 = arith.constant 5.000000e-01 : f32
    %26 = vector.broadcast %cst_20 : f32 to vector<8x128xf32>
    %27 = arith.addf %25, %26 : vector<8x128xf32>
    %28 = vector.extract_strided_slice %19 {offsets = [0, 128], sizes = [8, 128], strides = [1, 1]} : vector<8x512xf32> to vector<8x128xf32>
    %cst_21 = arith.constant 5.000000e-01 : f32
    %29 = vector.broadcast %cst_21 : f32 to vector<8x128xf32>
    %30 = arith.mulf %29, %28 : vector<8x128xf32>
    %31 = math.tanh %30 : vector<8x128xf32>
    %cst_22 = arith.constant 5.000000e-01 : f32
    %32 = vector.broadcast %cst_22 : f32 to vector<8x128xf32>
    %33 = arith.mulf %32, %31 : vector<8x128xf32>
    %cst_23 = arith.constant 5.000000e-01 : f32
    %34 = vector.broadcast %cst_23 : f32 to vector<8x128xf32>
    %35 = arith.addf %33, %34 : vector<8x128xf32>
    %36 = vector.extract_strided_slice %19 {offsets = [0, 256], sizes = [8, 128], strides = [1, 1]} : vector<8x512xf32> to vector<8x128xf32>
    %37 = math.tanh %36 : vector<8x128xf32>
    %38 = vector.extract_strided_slice %19 {offsets = [0, 384], sizes = [8, 128], strides = [1, 1]} : vector<8x512xf32> to vector<8x128xf32>
    %cst_24 = arith.constant 5.000000e-01 : f32
    %39 = vector.broadcast %cst_24 : f32 to vector<8x128xf32>
    %40 = arith.mulf %39, %38 : vector<8x128xf32>
    %41 = math.tanh %40 : vector<8x128xf32>
    %cst_25 = arith.constant 5.000000e-01 : f32
    %42 = vector.broadcast %cst_25 : f32 to vector<8x128xf32>
    %43 = arith.mulf %42, %41 : vector<8x128xf32>
    %cst_26 = arith.constant 5.000000e-01 : f32
    %44 = vector.broadcast %cst_26 : f32 to vector<8x128xf32>
    %45 = arith.addf %43, %44 : vector<8x128xf32>
    %46 = arith.mulf %35, %12 : vector<8x128xf32>
    %47 = arith.mulf %27, %37 : vector<8x128xf32>
    %48 = arith.addf %46, %47 : vector<8x128xf32>
    %49 = math.tanh %48 : vector<8x128xf32>
    %50 = arith.mulf %45, %49 : vector<8x128xf32>
    %51 = arith.index_cast %c0_i32_13 : i32 to index
    %c0_27 = arith.constant 0 : index
    %c0_28 = arith.constant 0 : index
    %52 = vector.load %arg8[%51, %c0_27, %c0_28] : memref<4x8x128xf32, #tpu.memory_space<vmem>>, vector<1x8x128xf32>
    %53 = vector.shape_cast %52 : vector<1x8x128xf32> to vector<8x128xf32>
    %54 = vector.shape_cast %50 : vector<8x128xf32> to vector<1x8x128xf32>
    tpu.vector_store %arg8[%51, %c0_27, %c0_28], %54 {strides = array<i32>} : memref<4x8x128xf32, #tpu.memory_space<vmem>>, vector<1x8x128xf32>,
    %55 = arith.index_cast %c0_i32_13 : i32 to index
    %c0_29 = arith.constant 0 : index
    %c0_30 = arith.constant 0 : index
    %56 = vector.load %arg9[%55, %c0_29, %c0_30] : memref<4x8x128xf32, #tpu.memory_space<vmem>>, vector<1x8x128xf32>
    %57 = vector.shape_cast %56 : vector<1x8x128xf32> to vector<8x128xf32>
    %58 = vector.shape_cast %48 : vector<8x128xf32> to vector<1x8x128xf32>
    tpu.vector_store %arg9[%55, %c0_29, %c0_30], %58 {strides = array<i32>} : memref<4x8x128xf32, #tpu.memory_space<vmem>>, vector<1x8x128xf32>,
    %c1_i32 = arith.constant 1 : i32
    %c8_i32_31 = arith.constant 8 : i32
    %59 = arith.muli %c1_i32, %c8_i32_31 : i32
    %60 = tpu.assume_multiple %59, 8 : i32
    %61 = arith.index_cast %60 : i32 to index
    %c0_32 = arith.constant 0 : index
    %62 = vector.load %arg10[%61, %c0_32] : memref<32x512xf32, #tpu.memory_space<vmem>>, vector<8x512xf32>
    %c0_33 = arith.constant 0 : index
    %c0_34 = arith.constant 0 : index
    %63 = vector.load %arg6[%c0_33, %c0_34] : memref<128x512xf32, #tpu.memory_space<vmem>>, vector<128x512xf32>
    %cst_35 = arith.constant dense<0.000000e+00> : vector<8x512xf32>
    %64 = tpu.matmul %50, %63, %cst_35 {dimension_numbers = #tpu.dot_dimension_numbers<[1], [0], [0], [1], [0, 0, 1, 1], [], []>} : vector<8x128xf32>, vector<128x512xf32>, vector<8x512xf32> -> vector<8x512xf32>
    %65 = arith.addf %62, %64 : vector<8x512xf32>
    %66 = vector.extract_strided_slice %65 {offsets = [0, 0], sizes = [8, 128], strides = [1, 1]} : vector<8x512xf32> to vector<8x128xf32>
    %cst_36 = arith.constant 5.000000e-01 : f32
    %67 = vector.broadcast %cst_36 : f32 to vector<8x128xf32>
    %68 = arith.mulf %67, %66 : vector<8x128xf32>
    %69 = math.tanh %68 : vector<8x128xf32>
    %cst_37 = arith.constant 5.000000e-01 : f32
    %70 = vector.broadcast %cst_37 : f32 to vector<8x128xf32>
    %71 = arith.mulf %70, %69 : vector<8x128xf32>
    %cst_38 = arith.constant 5.000000e-01 : f32
    %72 = vector.broadcast %cst_38 : f32 to vector<8x128xf32>
    %73 = arith.addf %71, %72 : vector<8x128xf32>
    %74 = vector.extract_strided_slice %65 {offsets = [0, 128], sizes = [8, 128], strides = [1, 1]} : vector<8x512xf32> to vector<8x128xf32>
    %cst_39 = arith.constant 5.000000e-01 : f32
    %75 = vector.broadcast %cst_39 : f32 to vector<8x128xf32>
    %76 = arith.mulf %75, %74 : vector<8x128xf32>
    %77 = math.tanh %76 : vector<8x128xf32>
    %cst_40 = arith.constant 5.000000e-01 : f32
    %78 = vector.broadcast %cst_40 : f32 to vector<8x128xf32>
    %79 = arith.mulf %78, %77 : vector<8x128xf32>
    %cst_41 = arith.constant 5.000000e-01 : f32
    %80 = vector.broadcast %cst_41 : f32 to vector<8x128xf32>
    %81 = arith.addf %79, %80 : vector<8x128xf32>
    %82 = vector.extract_strided_slice %65 {offsets = [0, 256], sizes = [8, 128], strides = [1, 1]} : vector<8x512xf32> to vector<8x128xf32>
    %83 = math.tanh %82 : vector<8x128xf32>
    %84 = vector.extract_strided_slice %65 {offsets = [0, 384], sizes = [8, 128], strides = [1, 1]} : vector<8x512xf32> to vector<8x128xf32>
    %cst_42 = arith.constant 5.000000e-01 : f32
    %85 = vector.broadcast %cst_42 : f32 to vector<8x128xf32>
    %86 = arith.mulf %85, %84 : vector<8x128xf32>
    %87 = math.tanh %86 : vector<8x128xf32>
    %cst_43 = arith.constant 5.000000e-01 : f32
    %88 = vector.broadcast %cst_43 : f32 to vector<8x128xf32>
    %89 = arith.mulf %88, %87 : vector<8x128xf32>
    %cst_44 = arith.constant 5.000000e-01 : f32
    %90 = vector.broadcast %cst_44 : f32 to vector<8x128xf32>
    %91 = arith.addf %89, %90 : vector<8x128xf32>
    %92 = arith.mulf %81, %48 : vector<8x128xf32>
    %93 = arith.mulf %73, %83 : vector<8x128xf32>
    %94 = arith.addf %92, %93 : vector<8x128xf32>
    %95 = math.tanh %94 : vector<8x128xf32>
    %96 = arith.mulf %91, %95 : vector<8x128xf32>
    %97 = arith.index_cast %c1_i32 : i32 to index
    %c0_45 = arith.constant 0 : index
    %c0_46 = arith.constant 0 : index
    %98 = vector.load %arg8[%97, %c0_45, %c0_46] : memref<4x8x128xf32, #tpu.memory_space<vmem>>, vector<1x8x128xf32>
    %99 = vector.shape_cast %98 : vector<1x8x128xf32> to vector<8x128xf32>
    %100 = vector.shape_cast %96 : vector<8x128xf32> to vector<1x8x128xf32>
    tpu.vector_store %arg8[%97, %c0_45, %c0_46], %100 {strides = array<i32>} : memref<4x8x128xf32, #tpu.memory_space<vmem>>, vector<1x8x128xf32>,
    %101 = arith.index_cast %c1_i32 : i32 to index
    %c0_47 = arith.constant 0 : index
    %c0_48 = arith.constant 0 : index
    %102 = vector.load %arg9[%101, %c0_47, %c0_48] : memref<4x8x128xf32, #tpu.memory_space<vmem>>, vector<1x8x128xf32>
    %103 = vector.shape_cast %102 : vector<1x8x128xf32> to vector<8x128xf32>
    %104 = vector.shape_cast %94 : vector<8x128xf32> to vector<1x8x128xf32>
    tpu.vector_store %arg9[%101, %c0_47, %c0_48], %104 {strides = array<i32>} : memref<4x8x128xf32, #tpu.memory_space<vmem>>, vector<1x8x128xf32>,
    %c2_i32 = arith.constant 2 : i32
    %c8_i32_49 = arith.constant 8 : i32
    %105 = arith.muli %c2_i32, %c8_i32_49 : i32
    %106 = tpu.assume_multiple %105, 8 : i32
    %107 = arith.index_cast %106 : i32 to index
    %c0_50 = arith.constant 0 : index
    %108 = vector.load %arg10[%107, %c0_50] : memref<32x512xf32, #tpu.memory_space<vmem>>, vector<8x512xf32>
    %c0_51 = arith.constant 0 : index
    %c0_52 = arith.constant 0 : index
    %109 = vector.load %arg6[%c0_51, %c0_52] : memref<128x512xf32, #tpu.memory_space<vmem>>, vector<128x512xf32>
    %cst_53 = arith.constant dense<0.000000e+00> : vector<8x512xf32>
    %110 = tpu.matmul %96, %109, %cst_53 {dimension_numbers = #tpu.dot_dimension_numbers<[1], [0], [0], [1], [0, 0, 1, 1], [], []>} : vector<8x128xf32>, vector<128x512xf32>, vector<8x512xf32> -> vector<8x512xf32>
    %111 = arith.addf %108, %110 : vector<8x512xf32>
    %112 = vector.extract_strided_slice %111 {offsets = [0, 0], sizes = [8, 128], strides = [1, 1]} : vector<8x512xf32> to vector<8x128xf32>
    %cst_54 = arith.constant 5.000000e-01 : f32
    %113 = vector.broadcast %cst_54 : f32 to vector<8x128xf32>
    %114 = arith.mulf %113, %112 : vector<8x128xf32>
    %115 = math.tanh %114 : vector<8x128xf32>
    %cst_55 = arith.constant 5.000000e-01 : f32
    %116 = vector.broadcast %cst_55 : f32 to vector<8x128xf32>
    %117 = arith.mulf %116, %115 : vector<8x128xf32>
    %cst_56 = arith.constant 5.000000e-01 : f32
    %118 = vector.broadcast %cst_56 : f32 to vector<8x128xf32>
    %119 = arith.addf %117, %118 : vector<8x128xf32>
    %120 = vector.extract_strided_slice %111 {offsets = [0, 128], sizes = [8, 128], strides = [1, 1]} : vector<8x512xf32> to vector<8x128xf32>
    %cst_57 = arith.constant 5.000000e-01 : f32
    %121 = vector.broadcast %cst_57 : f32 to vector<8x128xf32>
    %122 = arith.mulf %121, %120 : vector<8x128xf32>
    %123 = math.tanh %122 : vector<8x128xf32>
    %cst_58 = arith.constant 5.000000e-01 : f32
    %124 = vector.broadcast %cst_58 : f32 to vector<8x128xf32>
    %125 = arith.mulf %124, %123 : vector<8x128xf32>
    %cst_59 = arith.constant 5.000000e-01 : f32
    %126 = vector.broadcast %cst_59 : f32 to vector<8x128xf32>
    %127 = arith.addf %125, %126 : vector<8x128xf32>
    %128 = vector.extract_strided_slice %111 {offsets = [0, 256], sizes = [8, 128], strides = [1, 1]} : vector<8x512xf32> to vector<8x128xf32>
    %129 = math.tanh %128 : vector<8x128xf32>
    %130 = vector.extract_strided_slice %111 {offsets = [0, 384], sizes = [8, 128], strides = [1, 1]} : vector<8x512xf32> to vector<8x128xf32>
    %cst_60 = arith.constant 5.000000e-01 : f32
    %131 = vector.broadcast %cst_60 : f32 to vector<8x128xf32>
    %132 = arith.mulf %131, %130 : vector<8x128xf32>
    %133 = math.tanh %132 : vector<8x128xf32>
    %cst_61 = arith.constant 5.000000e-01 : f32
    %134 = vector.broadcast %cst_61 : f32 to vector<8x128xf32>
    %135 = arith.mulf %134, %133 : vector<8x128xf32>
    %cst_62 = arith.constant 5.000000e-01 : f32
    %136 = vector.broadcast %cst_62 : f32 to vector<8x128xf32>
    %137 = arith.addf %135, %136 : vector<8x128xf32>
    %138 = arith.mulf %127, %94 : vector<8x128xf32>
    %139 = arith.mulf %119, %129 : vector<8x128xf32>
    %140 = arith.addf %138, %139 : vector<8x128xf32>
    %141 = math.tanh %140 : vector<8x128xf32>
    %142 = arith.mulf %137, %141 : vector<8x128xf32>
    %143 = arith.index_cast %c2_i32 : i32 to index
    %c0_63 = arith.constant 0 : index
    %c0_64 = arith.constant 0 : index
    %144 = vector.load %arg8[%143, %c0_63, %c0_64] : memref<4x8x128xf32, #tpu.memory_space<vmem>>, vector<1x8x128xf32>
    %145 = vector.shape_cast %144 : vector<1x8x128xf32> to vector<8x128xf32>
    %146 = vector.shape_cast %142 : vector<8x128xf32> to vector<1x8x128xf32>
    tpu.vector_store %arg8[%143, %c0_63, %c0_64], %146 {strides = array<i32>} : memref<4x8x128xf32, #tpu.memory_space<vmem>>, vector<1x8x128xf32>,
    %147 = arith.index_cast %c2_i32 : i32 to index
    %c0_65 = arith.constant 0 : index
    %c0_66 = arith.constant 0 : index
    %148 = vector.load %arg9[%147, %c0_65, %c0_66] : memref<4x8x128xf32, #tpu.memory_space<vmem>>, vector<1x8x128xf32>
    %149 = vector.shape_cast %148 : vector<1x8x128xf32> to vector<8x128xf32>
    %150 = vector.shape_cast %140 : vector<8x128xf32> to vector<1x8x128xf32>
    tpu.vector_store %arg9[%147, %c0_65, %c0_66], %150 {strides = array<i32>} : memref<4x8x128xf32, #tpu.memory_space<vmem>>, vector<1x8x128xf32>,
    %c3_i32 = arith.constant 3 : i32
    %c8_i32_67 = arith.constant 8 : i32
    %151 = arith.muli %c3_i32, %c8_i32_67 : i32
    %152 = tpu.assume_multiple %151, 8 : i32
    %153 = arith.index_cast %152 : i32 to index
    %c0_68 = arith.constant 0 : index
    %154 = vector.load %arg10[%153, %c0_68] : memref<32x512xf32, #tpu.memory_space<vmem>>, vector<8x512xf32>
    %c0_69 = arith.constant 0 : index
    %c0_70 = arith.constant 0 : index
    %155 = vector.load %arg6[%c0_69, %c0_70] : memref<128x512xf32, #tpu.memory_space<vmem>>, vector<128x512xf32>
    %cst_71 = arith.constant dense<0.000000e+00> : vector<8x512xf32>
    %156 = tpu.matmul %142, %155, %cst_71 {dimension_numbers = #tpu.dot_dimension_numbers<[1], [0], [0], [1], [0, 0, 1, 1], [], []>} : vector<8x128xf32>, vector<128x512xf32>, vector<8x512xf32> -> vector<8x512xf32>
    %157 = arith.addf %154, %156 : vector<8x512xf32>
    %158 = vector.extract_strided_slice %157 {offsets = [0, 0], sizes = [8, 128], strides = [1, 1]} : vector<8x512xf32> to vector<8x128xf32>
    %cst_72 = arith.constant 5.000000e-01 : f32
    %159 = vector.broadcast %cst_72 : f32 to vector<8x128xf32>
    %160 = arith.mulf %159, %158 : vector<8x128xf32>
    %161 = math.tanh %160 : vector<8x128xf32>
    %cst_73 = arith.constant 5.000000e-01 : f32
    %162 = vector.broadcast %cst_73 : f32 to vector<8x128xf32>
    %163 = arith.mulf %162, %161 : vector<8x128xf32>
    %cst_74 = arith.constant 5.000000e-01 : f32
    %164 = vector.broadcast %cst_74 : f32 to vector<8x128xf32>
    %165 = arith.addf %163, %164 : vector<8x128xf32>
    %166 = vector.extract_strided_slice %157 {offsets = [0, 128], sizes = [8, 128], strides = [1, 1]} : vector<8x512xf32> to vector<8x128xf32>
    %cst_75 = arith.constant 5.000000e-01 : f32
    %167 = vector.broadcast %cst_75 : f32 to vector<8x128xf32>
    %168 = arith.mulf %167, %166 : vector<8x128xf32>
    %169 = math.tanh %168 : vector<8x128xf32>
    %cst_76 = arith.constant 5.000000e-01 : f32
    %170 = vector.broadcast %cst_76 : f32 to vector<8x128xf32>
    %171 = arith.mulf %170, %169 : vector<8x128xf32>
    %cst_77 = arith.constant 5.000000e-01 : f32
    %172 = vector.broadcast %cst_77 : f32 to vector<8x128xf32>
    %173 = arith.addf %171, %172 : vector<8x128xf32>
    %174 = vector.extract_strided_slice %157 {offsets = [0, 256], sizes = [8, 128], strides = [1, 1]} : vector<8x512xf32> to vector<8x128xf32>
    %175 = math.tanh %174 : vector<8x128xf32>
    %176 = vector.extract_strided_slice %157 {offsets = [0, 384], sizes = [8, 128], strides = [1, 1]} : vector<8x512xf32> to vector<8x128xf32>
    %cst_78 = arith.constant 5.000000e-01 : f32
    %177 = vector.broadcast %cst_78 : f32 to vector<8x128xf32>
    %178 = arith.mulf %177, %176 : vector<8x128xf32>
    %179 = math.tanh %178 : vector<8x128xf32>
    %cst_79 = arith.constant 5.000000e-01 : f32
    %180 = vector.broadcast %cst_79 : f32 to vector<8x128xf32>
    %181 = arith.mulf %180, %179 : vector<8x128xf32>
    %cst_80 = arith.constant 5.000000e-01 : f32
    %182 = vector.broadcast %cst_80 : f32 to vector<8x128xf32>
    %183 = arith.addf %181, %182 : vector<8x128xf32>
    %184 = arith.mulf %173, %140 : vector<8x128xf32>
    %185 = arith.mulf %165, %175 : vector<8x128xf32>
    %186 = arith.addf %184, %185 : vector<8x128xf32>
    %187 = math.tanh %186 : vector<8x128xf32>
    %188 = arith.mulf %183, %187 : vector<8x128xf32>
    %189 = arith.index_cast %c3_i32 : i32 to index
    %c0_81 = arith.constant 0 : index
    %c0_82 = arith.constant 0 : index
    %190 = vector.load %arg8[%189, %c0_81, %c0_82] : memref<4x8x128xf32, #tpu.memory_space<vmem>>, vector<1x8x128xf32>
    %191 = vector.shape_cast %190 : vector<1x8x128xf32> to vector<8x128xf32>
    %192 = vector.shape_cast %188 : vector<8x128xf32> to vector<1x8x128xf32>
    tpu.vector_store %arg8[%189, %c0_81, %c0_82], %192 {strides = array<i32>} : memref<4x8x128xf32, #tpu.memory_space<vmem>>, vector<1x8x128xf32>,
    %193 = arith.index_cast %c3_i32 : i32 to index
    %c0_83 = arith.constant 0 : index
    %c0_84 = arith.constant 0 : index
    %194 = vector.load %arg9[%193, %c0_83, %c0_84] : memref<4x8x128xf32, #tpu.memory_space<vmem>>, vector<1x8x128xf32>
    %195 = vector.shape_cast %194 : vector<1x8x128xf32> to vector<8x128xf32>
    %196 = vector.shape_cast %186 : vector<8x128xf32> to vector<1x8x128xf32>
    tpu.vector_store %arg9[%193, %c0_83, %c0_84], %196 {strides = array<i32>} : memref<4x8x128xf32, #tpu.memory_space<vmem>>, vector<1x8x128xf32>,
    %c4_i32 = arith.constant 4 : i32
    %c0_85 = arith.constant 0 : index
    %c0_86 = arith.constant 0 : index
    %197 = vector.load %arg11[%c0_85, %c0_86] : memref<8x128xf32, #tpu.memory_space<vmem>>, vector<8x128xf32>
    tpu.vector_store %arg11[%c0_85, %c0_86], %188 {strides = array<i32>} : memref<8x128xf32, #tpu.memory_space<vmem>>, vector<8x128xf32>,
    %c0_87 = arith.constant 0 : index
    %c0_88 = arith.constant 0 : index
    %198 = vector.load %arg12[%c0_87, %c0_88] : memref<8x128xf32, #tpu.memory_space<vmem>>, vector<8x128xf32>
    tpu.vector_store %arg12[%c0_87, %c0_88], %186 {strides = array<i32>} : memref<8x128xf32, #tpu.memory_space<vmem>>, vector<8x128xf32>,
    return
  }
  func.func @transform_0(%arg0: i32, %arg1: i32) -> (i32, i32, i32) {
    %c0_i32 = arith.constant 0 : i32
    %c0_i32_0 = arith.constant 0 : i32
    return %arg1, %arg0, %c0_i32 : i32, i32, i32
  }
  func.func @transform_1(%arg0: i32, %arg1: i32) -> (i32, i32) {
    %c0_i32 = arith.constant 0 : i32
    %c0_i32_0 = arith.constant 0 : i32
    return %arg0, %c0_i32 : i32, i32
  }
  func.func @transform_2(%arg0: i32, %arg1: i32) -> (i32, i32) {
    %c0_i32 = arith.constant 0 : i32
    %c0_i32_0 = arith.constant 0 : i32
    return %arg0, %c0_i32 : i32, i32
  }
  func.func @transform_3(%arg0: i32, %arg1: i32) -> (i32, i32) {
    %c0_i32 = arith.constant 0 : i32
    %c0_i32_0 = arith.constant 0 : i32
    %c0_i32_1 = arith.constant 0 : i32
    return %c0_i32, %c0_i32_0 : i32, i32
  }
  func.func @transform_4(%arg0: i32, %arg1: i32) -> (i32, i32) {
    %c0_i32 = arith.constant 0 : i32
    %c0_i32_0 = arith.constant 0 : i32
    %c0_i32_1 = arith.constant 0 : i32
    return %c0_i32, %c0_i32_0 : i32, i32
  }
  func.func @transform_5(%arg0: i32, %arg1: i32) -> (i32, i32) {
    %c0_i32 = arith.constant 0 : i32
    %c0_i32_0 = arith.constant 0 : i32
    %c0_i32_1 = arith.constant 0 : i32
    return %c0_i32, %c0_i32_0 : i32, i32
  }
  func.func @transform_6(%arg0: i32, %arg1: i32) -> (i32, i32, i32) {
    %c0_i32 = arith.constant 0 : i32
    %c0_i32_0 = arith.constant 0 : i32
    return %arg1, %arg0, %c0_i32 : i32, i32, i32
  }
  func.func @transform_7(%arg0: i32, %arg1: i32) -> (i32, i32, i32) {
    %c0_i32 = arith.constant 0 : i32
    %c0_i32_0 = arith.constant 0 : i32
    return %arg1, %arg0, %c0_i32 : i32, i32, i32
  }
}

</mosaic_0001>

<bundles_post_ra>
// kernel: custom_lstm_rollout.1
= control target key start
LH: loop header
LB: loop body
LE: loop exit
PB: predicated region body
PF: predicated region fallthrough
CT: control target
= control target key end

     0   :  { %s2187_s24 = smov 0   ;;  %s2189_s25 = smov 0   ;;  %s2716_s0 = inlined_call_operand.vmem [shape: f32[8,8,16], index: 0, kind: input, shape index: {}]   ;;  %s2717_s1 = inlined_call_operand.vmem [shape: f32[8,128], index: 1, kind: input, shape index: {}]   ;;  %s2718_s2 = inlined_call_operand.vmem [shape: f32[8,128], index: 2, kind: input, shape index: {}]   ;;  %s2719_s3 = inlined_call_operand.vmem [shape: f32[16,512], index: 3, kind: input, shape index: {}]   ;;  %s2720_s4 = inlined_call_operand.vmem [shape: f32[128,512], index: 4, kind: input, shape index: {}]   ;;  %s2721_s5 = inlined_call_operand.vmem [shape: f32[1,512], index: 5, kind: input, shape index: {}]   ;;  %s2722_s6 = inlined_call_operand.vmem [shape: f32[8,8,128], index: 6, kind: output, shape index: {0}]   ;;  %s2723_s7 = inlined_call_operand.vmem [shape: f32[8,8,128], index: 7, kind: output, shape index: {1}]  }
   0x1   :  { %s2191_s26 = smov 0  }
   0x2 LB: > { %s27_s27 = sadd.s32 1, %s2140_s25  ;;  %p1737_p0 = scmp.ge.s32.totalorder %s2144_s26, 1  ;;  %s2144_s26 = sphi %s2191_s26, %s18_s26   ;;  %s2140_s25 = sphi %s2189_s25, %s2725_s25   ;;  %s2136_s24 = sphi %s2187_s24, %s2724_s24  }
   0x3   : > { %p28_p1 = scmp.ge.s32.totalorder %s27_s27, 2  ;;  %p280_p2 = scmp.lt.s32.totalorder %s2144_s26, 3 }
   0x5   : > { %s2727_s27 = smov (%p28_p1, %s27_s27), 0  ;;  %p281_p3 = pnand %p1737_p0, %p280_p2 }
   0x6   : > { %s1738_s28 = sshll.u32 (!%p281_p3), %s2136_s24, 2  ;;  %p1744_p5 = scmp.ne.s32.totalorder (!%p281_p3), %s2136_s24, 0 }
   0x7   : > { %284 = sbr.rel (%p281_p3) target bundleno = 1058 (0x422), region = 44  ;;  %p335_p4 = scmp.lt.s32.totalorder (!%p281_p3), %s1738_s28, 7 }
   0xe   : > { %s2729_s28 = smov (!%p335_p4, %s1738_s28), 7  ;;  %372 = sbr.rel (%p1744_p5) target bundleno = 21 (0x15), region = 48 }
   0xf   : > { %s1739_s29 = sshll.u32 %s2729_s28, 3  ;;  %v373_v0 = vld [vmem:[%s2717_s1] sm:$0xff] (!%p1744_p5) }
  0x10   : > { %s2208_s9 = scalar_lea.vmem %s2716_s0, %s1739_s29  ;;  %s2213_s12 = scalar_lea.vmem %s2722_s6, %s1739_s29  ;;  %v375_v1 = vld [vmem:[%s2718_s2] sm:$0xff] (!%p1744_p5)  ;;  %374 = vst [vmem:[#allocation3] sm:$0xff] (!%p1744_p5), %v373_v0 }
  0x11   : > { %s2218_s15 = scalar_lea.vmem %s2723_s7, %s1739_s29  ;;  %376 = vst [vmem:[#allocation4] sm:$0xff] (!%p1744_p5), %v375_v1 }
  0x15 PF: > { %v382_v2 = vld [vmem:[%s2719_s3 + $0x8] sm:$0xff]  ;;  %v384_v4 = vld [vmem:[%s2719_s3 + $0x18] sm:$0xff]  ;;  %v381_v7 = vld [vmem:[%s2719_s3] sm:$0xff]  ;;  %v2146_v9 = vmov 0.0   ;;  %vm411_vm0 = vcmask 130048  }
  0x16   : > { %v386_v3 = vld [vmem:[%s2719_s3 + $0x28] sm:$0xff]  ;;  %v388_v6 = vld [vmem:[%s2719_s3 + $0x38] sm:$0xff]  ;;  %v385_v8 = vld [vmem:[%s2719_s3 + $0x20] sm:$0xff]  ;;  %488 = vmatprep.mubr.f32.mxu0 %v2146_v9  ;;  %577 = vmatprep.mubr.f32.mxu1 %v2146_v9 }
  0x17   : > { %v1761_v5 = vpack.c.bf16 %v386_v3, %v382_v2  ;;  %v1765_v10 = vpack.c.bf16 %v388_v6, %v384_v4  ;;  %v1763_v11 = vpack.c.bf16 %v385_v8, %v381_v7  ;;  %v383_v12 = vld [vmem:[%s2719_s3 + $0x10] sm:$0xff]  ;;  %v628_v14 = vld [vmem:[%s2720_s4 + $0x8] sm:$0xff]  ;;  %v630_v17 = vld [vmem:[%s2720_s4 + $0x18] sm:$0xff] }
  0x18   : > { %v387_v13 = vld [vmem:[%s2719_s3 + $0x30] sm:$0xff]  ;;  %v632_v16 = vld [vmem:[%s2720_s4 + $0x28] sm:$0xff]  ;;  %v634_v18 = vld [vmem:[%s2720_s4 + $0x38] sm:$0xff] }
  0x19   : > { %1762 = vmatprep.subr.bf16.mxu0 %v1761_v5  ;;  %v1767_v15 = vpack.c.bf16 %v387_v13, %v383_v12  ;;  %1766 = vmatprep.subr.bf16.mxu1 %v1765_v10  ;;  %v2264_v19 = vpack.c.bf16 %v632_v16, %v628_v14  ;;  %v2266_v20 = vpack.c.bf16 %v634_v18, %v630_v17  ;;  %v377_v21 = vld [vmem:[%s2208_s9] sm:$0xff]  ;;  %v629_v25 = vld [vmem:[%s2720_s4 + $0x10] sm:$0xff]  ;;  %v636_v27 = vld [vmem:[%s2720_s4 + $0x48] sm:$0xff] }
  0x1a   : > { %1764 = vmatpush1.bf16.msra.mxu0 %v1763_v11  ;;  %v627_v22 = vld [vmem:[%s2720_s4] sm:$0xff]  ;;  %v633_v26 = vld [vmem:[%s2720_s4 + $0x30] sm:$0xff]  ;;  %v640_v29 = vld [vmem:[%s2720_s4 + $0x68] sm:$0xff] }
  0x1b   : > { %v631_v23 = vld [vmem:[%s2720_s4 + $0x20] sm:$0xff]  ;;  %1768 = vmatpush1.bf16.msra.mxu1 %v1767_v15  ;;  %1770 = vmatprep.subr.bf16.mxu0 %v2264_v19  ;;  %v2288_v28 = vpack.c.bf16 %v633_v26, %v629_v25  ;;  %v638_v30 = vld [vmem:[%s2720_s4 + $0x58] sm:$0xff]  ;;  %v2300_v32 = vpack.c.bf16 %v640_v29, %v636_v27  ;;  %v637_v36 = vld [vmem:[%s2720_s4 + $0x50] sm:$0xff] }
  0x1c   : > { %v2275_v24 = vpack.c.bf16 %v631_v23, %v627_v22  ;;  %1802 = vmatprep.subr.bf16.mxu1 %v2266_v20  ;;  %v642_v31 = vld [vmem:[%s2720_s4 + $0x78] sm:$0xff]  ;;  %v635_v34 = vld [vmem:[%s2720_s4 + $0x40] sm:$0xff]  ;;  %v641_v38 = vld [vmem:[%s2720_s4 + $0x70] sm:$0xff] }
  0x1d   : > { %1745 = vmatmul.mubr.msk.f32.vlgmr.msra.gmra.mrb[0].mxu0 %vm411_vm0, %v377_v21  ;;  %v2302_v33 = vpack.c.bf16 %v642_v31, %v638_v30  ;;  %v639_v35 = vld [vmem:[%s2720_s4 + $0x60] sm:$0xff]  ;;  %v644_v39 = vld [vmem:[%s2720_s4 + $0x88] sm:$0xff]  ;;  %v2328_v41 = vpack.c.bf16 %v641_v38, %v637_v36  ;;  %v646_v43 = vld [vmem:[%s2720_s4 + $0x98] sm:$0xff] }
  0x1e   : > { %1749 = vmatmul.mubr.msk.f32.vlgmr.msra.gmra.mrb[0].mxu1 %vm411_vm0, %v377_v21  ;;  %1772 = vmatpush1.bf16.msra.mxu0 %v2275_v24  ;;  %v2315_v37 = vpack.c.bf16 %v639_v35, %v635_v34  ;;  %v648_v40 = vld [vmem:[%s2720_s4 + $0xa8] sm:$0xff]  ;;  %v650_v44 = vld [vmem:[%s2720_s4 + $0xb8] sm:$0xff]  ;;  %v643_v45 = vld [vmem:[%s2720_s4 + $0x80] sm:$0xff] }
  0x1f   : > { %1804 = vmatpush1.bf16.msra.mxu1 %v2288_v28  ;;  %1774 = vmatprep.subr.bf16.mxu0 %v2300_v32  ;;  %v2330_v42 = vpack.c.bf16 %v648_v40, %v644_v39  ;;  %v2342_v46 = vpack.c.bf16 %v650_v44, %v646_v43  ;;  %v647_v47 = vld [vmem:[%s2720_s4 + $0xa0] sm:$0xff]  ;;  %v645_v48 = vld [vmem:[%s2720_s4 + $0x90] sm:$0xff]  ;;  %v652_v50 = vld [vmem:[%s2720_s4 + $0xc8] sm:$0xff] }
  0x20   : > { %1806 = vmatprep.subr.bf16.mxu1 %v2302_v33  ;;  %v649_v49 = vld [vmem:[%s2720_s4 + $0xb0] sm:$0xff]  ;;  %494 = vmatprep.mubr.f32.mxu0 %v2146_v9  ;;  %v656_v51 = vld [vmem:[%s2720_s4 + $0xe8] sm:$0xff]  ;;  %v654_v52 = vld [vmem:[%s2720_s4 + $0xd8] sm:$0xff]  ;;  %v2365_v53 = vpack.c.bf16 %v647_v47, %v643_v45 }
  0x21   : > { %583 = vmatprep.mubr.f32.mxu1 %v2146_v9  ;;  %v658_v54 = vld [vmem:[%s2720_s4 + $0xf8] sm:$0xff]  ;;  %v2372_v55 = vpack.c.bf16 %v649_v49, %v645_v48  ;;  %v2374_v56 = vpack.c.bf16 %v656_v51, %v652_v50  ;;  %v651_v57 = vld [vmem:[%s2720_s4 + $0xc0] sm:$0xff]  ;;  %v653_v59 = vld [vmem:[%s2720_s4 + $0xd0] sm:$0xff] }
  0x22   : > { %1776 = vmatpush1.bf16.msra.mxu0 %v2315_v37  ;;  %v655_v58 = vld [vmem:[%s2720_s4 + $0xe0] sm:$0xff]  ;;  %v2386_v60 = vpack.c.bf16 %v658_v54, %v654_v52  ;;  %v657_v61 = vld [vmem:[%s2720_s4 + $0xf0] sm:$0xff]  ;;  %v660_v62 = vld [vmem:[%s2720_s4 + $0x108] sm:$0xff] }
  0x23   : > { %1808 = vmatpush1.bf16.msra.mxu1 %v2328_v41  ;;  %1778 = vmatprep.subr.bf16.mxu0 %v2330_v42  ;;  %v664_v63 = vld [vmem:[%s2720_s4 + $0x128] sm:$0xff]  ;;  %v662_v0 = vld [vmem:[%s2720_s4 + $0x118] sm:$0xff]  ;;  %v2404_v2 = vpack.c.bf16 %v655_v58, %v651_v57  ;;  %v2409_v4 = vpack.c.bf16 %v657_v61, %v653_v59  ;;  %v659_v6 = vld [vmem:[%s2720_s4 + $0x100] sm:$0xff] }
  0x24   : > { %1810 = vmatprep.subr.bf16.mxu1 %v2342_v46  ;;  %v666_v1 = vld [vmem:[%s2720_s4 + $0x138] sm:$0xff]  ;;  %v378_v3 = vld [vmem:[%s2208_s9 + $0x8] sm:$0xff]  ;;  %v2411_v5 = vpack.c.bf16 %v664_v63, %v660_v62  ;;  %v663_v7 = vld [vmem:[%s2720_s4 + $0x120] sm:$0xff] }
  0x25   : > { %v661_v8 = vld [vmem:[%s2720_s4 + $0x110] sm:$0xff]  ;;  %v2423_v10 = vpack.c.bf16 %v666_v1, %v662_v0  ;;  %1746 = vmatmul.mubr.msk.f32.gmra.mrb[2].mxu0 %vm411_vm0, %v378_v3  ;;  %v668_v12 = vld [vmem:[%s2720_s4 + $0x148] sm:$0xff]  ;;  %1750 = vmatmul.mubr.msk.f32.gmra.mrb[2].mxu1 %vm411_vm0, %v378_v3  ;;  %v670_v14 = vld [vmem:[%s2720_s4 + $0x158] sm:$0xff]  ;;  %v2445_v17 = vpack.c.bf16 %v663_v7, %v659_v6  ;;  %v391_v6 = vlaneseq }
  0x26   : > { %1780 = vmatpush1.bf16.msra.mxu0 %v2365_v53  ;;  %v665_v11 = vld [vmem:[%s2720_s4 + $0x130] sm:$0xff]  ;;  %v672_v13 = vld [vmem:[%s2720_s4 + $0x168] sm:$0xff]  ;;  %v674_v15 = vld [vmem:[%s2720_s4 + $0x178] sm:$0xff]  ;;  %500 = vmatprep.mubr.f32.mxu0 %v2146_v9 }
  0x27   : > { %1812 = vmatpush1.bf16.msra.mxu1 %v2372_v55  ;;  %1782 = vmatprep.subr.bf16.mxu0 %v2374_v56  ;;  %v379_v16 = vld [vmem:[%s2208_s9 + $0x10] sm:$0xff]  ;;  %v2450_v18 = vpack.c.bf16 %v665_v11, %v661_v8  ;;  %v2452_v21 = vpack.c.bf16 %v672_v13, %v668_v12  ;;  %v667_v22 = vld [vmem:[%s2720_s4 + $0x140] sm:$0xff]  ;;  %v2464_v26 = vpack.c.bf16 %v674_v15, %v670_v14  ;;  %v676_v29 = vld [vmem:[%s2720_s4 + $0x188] sm:$0xff]  ;;  %v392_v7 = vshrl.u32 %v391_v6, 7 }
  0x28   : > { %1814 = vmatprep.subr.bf16.mxu1 %v2386_v60  ;;  %589 = vmatprep.mubr.f32.mxu1 %v2146_v9  ;;  %v671_v23 = vld [vmem:[%s2720_s4 + $0x160] sm:$0xff]  ;;  %v669_v25 = vld [vmem:[%s2720_s4 + $0x150] sm:$0xff]  ;;  %v680_v30 = vld [vmem:[%s2720_s4 + $0x1a8] sm:$0xff] }
  0x29   : > { %v673_v27 = vld [vmem:[%s2720_s4 + $0x170] sm:$0xff]  ;;  %1747 = vmatmul.mubr.msk.f32.gmra.mrb[4].mxu0 %vm411_vm0, %v379_v16  ;;  %1751 = vmatmul.mubr.msk.f32.gmra.mrb[4].mxu1 %vm411_vm0, %v379_v16  ;;  %v678_v31 = vld [vmem:[%s2720_s4 + $0x198] sm:$0xff]  ;;  %v2486_v36 = vpack.c.bf16 %v671_v23, %v667_v22  ;;  %v2493_v39 = vpack.c.bf16 %v680_v30, %v676_v29  ;;  %v675_v40 = vld [vmem:[%s2720_s4 + $0x180] sm:$0xff]  ;;  %v393_v8 = vsub.s32 0, %v392_v7  ;;  %v397_v12 = vsub.s32 1, %v392_v7 }
  0x2a   : > { %1784 = vmatpush1.bf16.msra.mxu0 %v2404_v2  ;;  %v682_v34 = vld [vmem:[%s2720_s4 + $0x1b8] sm:$0xff]  ;;  %506 = vmatprep.mubr.f32.mxu0 %v2146_v9  ;;  %v2491_v38 = vpack.c.bf16 %v673_v27, %v669_v25  ;;  %v679_v43 = vld [vmem:[%s2720_s4 + $0x1a0] sm:$0xff]  ;;  %v677_v44 = vld [vmem:[%s2720_s4 + $0x190] sm:$0xff]  ;;  %v401_v14 = vsub.s32 2, %v392_v7  ;;  %v405_v29 = vsub.s32 3, %v392_v7 }
  0x2b   : > { %1816 = vmatpush1.bf16.msra.mxu1 %v2409_v4  ;;  %1786 = vmatprep.subr.bf16.mxu0 %v2411_v5  ;;  %v380_v35 = vld [vmem:[%s2208_s9 + $0x18] sm:$0xff]  ;;  %v2505_v45 = vpack.c.bf16 %v682_v34, %v678_v31  ;;  %v681_v47 = vld [vmem:[%s2720_s4 + $0x1b0] sm:$0xff]  ;;  %v684_v48 = vld [vmem:[%s2720_s4 + $0x1c8] sm:$0xff]  ;;  %v2526_v52 = vpack.c.bf16 %v679_v43, %v675_v40 }
  0x2c   : > { %1818 = vmatprep.subr.bf16.mxu1 %v2423_v10  ;;  %595 = vmatprep.mubr.f32.mxu1 %v2146_v9  ;;  %v688_v49 = vld [vmem:[%s2720_s4 + $0x1e8] sm:$0xff]  ;;  %v686_v50 = vld [vmem:[%s2720_s4 + $0x1d8] sm:$0xff]  ;;  %v2531_v54 = vpack.c.bf16 %v681_v47, %v677_v44  ;;  %v683_v58 = vld [vmem:[%s2720_s4 + $0x1c0] sm:$0xff] }
  0x2d   : > { %1748 = vmatmul.mubr.msk.f32.gmra.mrb[6].mxu0 %vm411_vm0, %v380_v35  ;;  %1752 = vmatmul.mubr.msk.f32.gmra.mrb[6].mxu1 %vm411_vm0, %v380_v35  ;;  %v690_v51 = vld [vmem:[%s2720_s4 + $0x1f8] sm:$0xff]  ;;  %v2533_v57 = vpack.c.bf16 %v688_v49, %v684_v48  ;;  %v687_v59 = vld [vmem:[%s2720_s4 + $0x1e0] sm:$0xff]  ;;  %v685_v62 = vld [vmem:[%s2720_s4 + $0x1d0] sm:$0xff] }
  0x2e   : > { %1788 = vmatpush1.bf16.msra.mxu0 %v2445_v17  ;;  %755 = vmatprep.mubr.f32.mxu0 %v2146_v9  ;;  %v2542_v61 = vpack.c.bf16 %v690_v51, %v686_v50  ;;  %v689_v63 = vld [vmem:[%s2720_s4 + $0x1f0] sm:$0xff]  ;;  %v2551_v0 = vpack.c.bf16 %v687_v59, %v683_v58  ;;  %v618_v3 = vld [vmem:[#allocation3] sm:$0xff]  ;;  %v619_v59 = vld [vmem:[#allocation4] sm:$0xff] }
  0x2f   : > { %1820 = vmatpush1.bf16.msra.mxu1 %v2450_v18  ;;  %1790 = vmatprep.subr.bf16.mxu0 %v2452_v21  ;;  %v2555_v1 = vpack.c.bf16 %v689_v63, %v685_v62  ;;  %v389_v11 = vld [vmem:[%s2721_s5] sm:$0xf] }
  0x30   : > { %1822 = vmatprep.subr.bf16.mxu1 %v2464_v26  ;;  %826 = vmatprep.mubr.f32.mxu1 %v2146_v9  ;;  %v2599_v13 = vrot.slane %v389_v11, %v393_v8  ;;  %v2601_v15 = vrot.slane %v389_v11, %v397_v12  ;;  %v2604_v23 = vrot.slane %v389_v11, %v401_v14 }
  0x31   : > { %v2608_v43 = vrot.slane %v389_v11, %v405_v29 }
  0x32   : > { %1792 = vmatpush1.bf16.msra.mxu0 %v2486_v36 }
  0x33   : > { %1824 = vmatpush1.bf16.msra.mxu1 %v2491_v38  ;;  %1794 = vmatprep.subr.bf16.mxu0 %v2493_v39 }
  0x34   : > { %1826 = vmatprep.subr.bf16.mxu1 %v2505_v45 }
  0x36   : > { %1796 = vmatpush1.bf16.msra.mxu0 %v2526_v52 }
  0x37   : > { %1828 = vmatpush1.bf16.msra.mxu1 %v2531_v54  ;;  %1798 = vmatprep.subr.bf16.mxu0 %v2533_v57 }
  0x38   : > { %1830 = vmatprep.subr.bf16.mxu1 %v2542_v61 }
  0x3a   : > { %1800 = vmatpush1.bf16.msra.mxu0 %v2551_v0 }
  0x3b   : > { %1832 = vmatpush1.bf16.msra.mxu1 %v2555_v1  ;;  %1834 = vmatprep.subr.bf16.mxu0 %v2264_v19 }
  0x3c   : > { %1866 = vmatprep.subr.bf16.mxu1 %v2266_v20 }
  0x3d   : > { %756 = vmatmul.mubr.f32.vlgmr.msra.gmra.mrb[0].mxu0 %v618_v3 }
  0x3e   : > { %827 = vmatmul.mubr.f32.vlgmr.msra.gmra.mrb[0].mxu1 %v618_v3  ;;  %1836 = vmatpush1.bf16.msra.mxu0 %v2275_v24 }
  0x3f   : > { %1868 = vmatpush1.bf16.msra.mxu1 %v2288_v28  ;;  %1838 = vmatprep.subr.bf16.mxu0 %v2300_v32 }
  0x40   : > { %1870 = vmatprep.subr.bf16.mxu1 %v2302_v33  ;;  %992 = vmatprep.mubr.f32.mxu0 %v2146_v9 }
  0x41   : > { %1063 = vmatprep.mubr.f32.mxu1 %v2146_v9 }
  0x42   : > { %1840 = vmatpush1.bf16.msra.mxu0 %v2315_v37 }
  0x43   : > { %1872 = vmatpush1.bf16.msra.mxu1 %v2328_v41  ;;  %1842 = vmatprep.subr.bf16.mxu0 %v2330_v42 }
  0x44   : > { %1874 = vmatprep.subr.bf16.mxu1 %v2342_v46 }
  0x46   : > { %1844 = vmatpush1.bf16.msra.mxu0 %v2365_v53 }
  0x47   : > { %1876 = vmatpush1.bf16.msra.mxu1 %v2372_v55  ;;  %1846 = vmatprep.subr.bf16.mxu0 %v2374_v56 }
  0x48   : > { %1878 = vmatprep.subr.bf16.mxu1 %v2386_v60 }
  0x4a   : > { %1848 = vmatpush1.bf16.msra.mxu0 %v2404_v2 }
  0x4b   : > { %1880 = vmatpush1.bf16.msra.mxu1 %v2409_v4  ;;  %1850 = vmatprep.subr.bf16.mxu0 %v2411_v5 }
  0x4c   : > { %1882 = vmatprep.subr.bf16.mxu1 %v2423_v10 }
  0x4e   : > { %1852 = vmatpush1.bf16.msra.mxu0 %v2445_v17 }
  0x4f   : > { %1884 = vmatpush1.bf16.msra.mxu1 %v2450_v18  ;;  %1854 = vmatprep.subr.bf16.mxu0 %v2452_v21 }
  0x50   : > { %1886 = vmatprep.subr.bf16.mxu1 %v2464_v26 }
  0x52   : > { %1856 = vmatpush1.bf16.msra.mxu0 %v2486_v36 }
  0x53   : > { %1888 = vmatpush1.bf16.msra.mxu1 %v2491_v38  ;;  %1858 = vmatprep.subr.bf16.mxu0 %v2493_v39 }
  0x54   : > { %1890 = vmatprep.subr.bf16.mxu1 %v2505_v45 }
  0x56   : > { %1860 = vmatpush1.bf16.msra.mxu0 %v2526_v52 }
  0x57   : > { %1892 = vmatpush1.bf16.msra.mxu1 %v2531_v54  ;;  %1862 = vmatprep.subr.bf16.mxu0 %v2533_v57 }
  0x58   : > { %1894 = vmatprep.subr.bf16.mxu1 %v2542_v61 }
  0x5a   : > { %1864 = vmatpush1.bf16.msra.mxu0 %v2551_v0 }
  0x5b   : > { %1896 = vmatpush1.bf16.msra.mxu1 %v2555_v1  ;;  %1898 = vmatprep.subr.bf16.mxu0 %v2264_v19 }
  0x5c   : > { %1930 = vmatprep.subr.bf16.mxu1 %v2266_v20 }
 0x110   : > { %v757_v16 = vpop.f32.mrb[0].mxu0 }
 0x111   : > { %v2025_v22 = vadd.f32 %v757_v16, %v2599_v13  ;;  %v828_v25 = vpop.f32.mrb[0].mxu1  ;;  %v759_v27 = vpop.f32.mrb[1].mxu0 }
 0x112   : > { %v2026_v30 = vadd.f32 %v759_v27, %v2601_v15  ;;  %v830_v31 = vpop.f32.mrb[1].mxu1  ;;  %v2033_v40 = vadd.f32 %v828_v25, %v2604_v23 }
 0x113   : > { %v837_v34 = vmul.f32 0.5, %v2025_v22  ;;  %v2034_v44 = vadd.f32 %v830_v31, %v2608_v43 }
 0x114   : > { %v841_v35 = vmul.f32 0.5, %v2026_v30 }
 0x115   : > { %2082 = vtanh.f32 %v837_v34  ;;  %v846_v47 = vmul.f32 0.5, %v2034_v44 }
 0x116   : > { %2084 = vtanh.f32 %v841_v35 }
 0x117   : > { %2086 = vtanh.f32 %v2033_v40 }
 0x118   : > { %2088 = vtanh.f32 %v846_v47 }
 0x11f   : > { %v2083_v48 = vpop.eup %2082 }
 0x120   : > { %v2085_v49 = vpop.eup %2084  ;;  %v839_v50 = vmul.f32 0.5, %v2083_v48 }
 0x121   : > { %v843_v51 = vmul.f32 0.5, %v2085_v49  ;;  %v2087_v62 = vpop.eup %2086 }
 0x122   : > { %v840_v58 = vadd.f32 0.5, %v839_v50  ;;  %v2089_v8 = vpop.eup %2088 }
 0x123   : > { %v844_v63 = vadd.f32 0.5, %v843_v51  ;;  %v848_v11 = vmul.f32 0.5, %v2089_v8 }
 0x124   : > { %v851_v3 = vmul.f32 %v2087_v62, %v840_v58 }
 0x125   : > { %v850_v6 = vmul.f32 %v844_v63, %v619_v59  ;;  %v849_v12 = vadd.f32 0.5, %v848_v11 }
 0x127   : > { %v2611_v7 = vadd.f32 %v851_v3, %v850_v6 }
 0x129   : > { %2090 = vtanh.f32 %v2611_v7  ;;  %856 = vst [vmem:[%s2218_s15] sm:$0xff] %v2611_v7 }
 0x133   : > { %v2091_v14 = vpop.eup %2090 }
 0x134   : > { %v854_v16 = vmul.f32 %v2091_v14, %v849_v12 }
 0x136   : > { %855 = vst [vmem:[%s2213_s12] sm:$0xff] %v854_v16  ;;  %993 = vmatmul.mubr.f32.vlgmr.msra.gmra.mrb[2].mxu0 %v854_v16  ;;  %1064 = vmatmul.mubr.f32.vlgmr.msra.gmra.mrb[2].mxu1 %v854_v16 }
 0x137   : > { %1900 = vmatpush1.bf16.msra.mxu0 %v2275_v24  ;;  %1932 = vmatpush1.bf16.msra.mxu1 %v2288_v28 }
 0x138   : > { %1902 = vmatprep.subr.bf16.mxu0 %v2300_v32  ;;  %1934 = vmatprep.subr.bf16.mxu1 %v2302_v33 }
 0x139   : > { %1231 = vmatprep.mubr.f32.mxu0 %v2146_v9  ;;  %1302 = vmatprep.mubr.f32.mxu1 %v2146_v9 }
 0x13b   : > { %1904 = vmatpush1.bf16.msra.mxu0 %v2315_v37  ;;  %1936 = vmatpush1.bf16.msra.mxu1 %v2328_v41 }
 0x13c   : > { %1906 = vmatprep.subr.bf16.mxu0 %v2330_v42  ;;  %1938 = vmatprep.subr.bf16.mxu1 %v2342_v46 }
 0x13f   : > { %1908 = vmatpush1.bf16.msra.mxu0 %v2365_v53  ;;  %1940 = vmatpush1.bf16.msra.mxu1 %v2372_v55 }
 0x140   : > { %1910 = vmatprep.subr.bf16.mxu0 %v2374_v56  ;;  %1942 = vmatprep.subr.bf16.mxu1 %v2386_v60 }
 0x143   : > { %1912 = vmatpush1.bf16.msra.mxu0 %v2404_v2  ;;  %1944 = vmatpush1.bf16.msra.mxu1 %v2409_v4 }
 0x144   : > { %1914 = vmatprep.subr.bf16.mxu0 %v2411_v5  ;;  %1946 = vmatprep.subr.bf16.mxu1 %v2423_v10 }
 0x147   : > { %1916 = vmatpush1.bf16.msra.mxu0 %v2445_v17  ;;  %1948 = vmatpush1.bf16.msra.mxu1 %v2450_v18 }
 0x148   : > { %1918 = vmatprep.subr.bf16.mxu0 %v2452_v21  ;;  %1950 = vmatprep.subr.bf16.mxu1 %v2464_v26 }
 0x14b   : > { %1920 = vmatpush1.bf16.msra.mxu0 %v2486_v36  ;;  %1952 = vmatpush1.bf16.msra.mxu1 %v2491_v38 }
 0x14c   : > { %1922 = vmatprep.subr.bf16.mxu0 %v2493_v39  ;;  %1954 = vmatprep.subr.bf16.mxu1 %v2505_v45 }
 0x14f   : > { %1924 = vmatpush1.bf16.msra.mxu0 %v2526_v52  ;;  %1956 = vmatpush1.bf16.msra.mxu1 %v2531_v54 }
 0x150   : > { %1926 = vmatprep.subr.bf16.mxu0 %v2533_v57  ;;  %1958 = vmatprep.subr.bf16.mxu1 %v2542_v61 }
 0x153   : > { %1928 = vmatpush1.bf16.msra.mxu0 %v2551_v0  ;;  %1960 = vmatpush1.bf16.msra.mxu1 %v2555_v1 }
 0x154   : > { %1962 = vmatprep.subr.bf16.mxu0 %v2264_v19  ;;  %1994 = vmatprep.subr.bf16.mxu1 %v2266_v20 }
 0x209   : > { %v994_v22 = vpop.f32.mrb[2].mxu0  ;;  %v1065_v25 = vpop.f32.mrb[2].mxu1 }
 0x20a   : > { %v2027_v27 = vadd.f32 %v994_v22, %v2599_v13  ;;  %v996_v29 = vpop.f32.mrb[3].mxu0  ;;  %v1067_v30 = vpop.f32.mrb[3].mxu1  ;;  %v2035_v40 = vadd.f32 %v1065_v25, %v2604_v23 }
 0x20b   : > { %v2028_v31 = vadd.f32 %v996_v29, %v2601_v15  ;;  %v2036_v19 = vadd.f32 %v1067_v30, %v2608_v43 }
 0x20c   : > { %v1074_v34 = vmul.f32 0.5, %v2027_v27 }
 0x20d   : > { %v1078_v35 = vmul.f32 0.5, %v2028_v31  ;;  %v1083_v44 = vmul.f32 0.5, %v2036_v19 }
 0x20e   : > { %2092 = vtanh.f32 %v1074_v34 }
 0x20f   : > { %2094 = vtanh.f32 %v1078_v35 }
 0x210   : > { %2096 = vtanh.f32 %v2035_v40 }
 0x211   : > { %2098 = vtanh.f32 %v1083_v44 }
 0x218   : > { %v2093_v20 = vpop.eup %2092 }
 0x219   : > { %v2095_v47 = vpop.eup %2094  ;;  %v1076_v48 = vmul.f32 0.5, %v2093_v20 }
 0x21a   : > { %v1080_v49 = vmul.f32 0.5, %v2095_v47  ;;  %v2097_v51 = vpop.eup %2096 }
 0x21b   : > { %v1077_v50 = vadd.f32 0.5, %v1076_v48  ;;  %v2099_v3 = vpop.eup %2098 }
 0x21c   : > { %v1081_v58 = vadd.f32 0.5, %v1080_v49  ;;  %v1085_v6 = vmul.f32 0.5, %v2099_v3 }
 0x21d   : > { %v1088_v59 = vmul.f32 %v2097_v51, %v1077_v50 }
 0x21e   : > { %v1087_v62 = vmul.f32 %v1081_v58, %v2611_v7  ;;  %v1086_v8 = vadd.f32 0.5, %v1085_v6 }
 0x220   : > { %v2656_v63 = vadd.f32 %v1088_v59, %v1087_v62 }
 0x222   : > { %2100 = vtanh.f32 %v2656_v63  ;;  %1754 = vst [vmem:[%s2218_s15 + $0x8] sm:$0xff] %v2656_v63 }
 0x22c   : > { %v2101_v11 = vpop.eup %2100 }
 0x22d   : > { %v1091_v12 = vmul.f32 %v2101_v11, %v1086_v8 }
 0x22f   : > { %1753 = vst [vmem:[%s2213_s12 + $0x8] sm:$0xff] %v1091_v12  ;;  %1232 = vmatmul.mubr.f32.vlgmr.msra.gmra.mrb[4].mxu0 %v1091_v12  ;;  %1303 = vmatmul.mubr.f32.vlgmr.msra.gmra.mrb[4].mxu1 %v1091_v12 }
 0x230   : > { %1964 = vmatpush1.bf16.msra.mxu0 %v2275_v24  ;;  %1996 = vmatpush1.bf16.msra.mxu1 %v2288_v28 }
 0x231   : > { %1966 = vmatprep.subr.bf16.mxu0 %v2300_v32  ;;  %1998 = vmatprep.subr.bf16.mxu1 %v2302_v33 }
 0x232   : > { %1470 = vmatprep.mubr.f32.mxu0 %v2146_v9  ;;  %1541 = vmatprep.mubr.f32.mxu1 %v2146_v9 }
 0x234   : > { %1968 = vmatpush1.bf16.msra.mxu0 %v2315_v37  ;;  %2000 = vmatpush1.bf16.msra.mxu1 %v2328_v41 }
 0x235   : > { %1970 = vmatprep.subr.bf16.mxu0 %v2330_v42  ;;  %2002 = vmatprep.subr.bf16.mxu1 %v2342_v46 }
 0x238   : > { %1972 = vmatpush1.bf16.msra.mxu0 %v2365_v53  ;;  %2004 = vmatpush1.bf16.msra.mxu1 %v2372_v55 }
 0x239   : > { %1974 = vmatprep.subr.bf16.mxu0 %v2374_v56  ;;  %2006 = vmatprep.subr.bf16.mxu1 %v2386_v60 }
 0x23c   : > { %1976 = vmatpush1.bf16.msra.mxu0 %v2404_v2  ;;  %2008 = vmatpush1.bf16.msra.mxu1 %v2409_v4 }
 0x23d   : > { %1978 = vmatprep.subr.bf16.mxu0 %v2411_v5  ;;  %2010 = vmatprep.subr.bf16.mxu1 %v2423_v10 }
 0x240   : > { %1980 = vmatpush1.bf16.msra.mxu0 %v2445_v17  ;;  %2012 = vmatpush1.bf16.msra.mxu1 %v2450_v18 }
 0x241   : > { %1982 = vmatprep.subr.bf16.mxu0 %v2452_v21  ;;  %2014 = vmatprep.subr.bf16.mxu1 %v2464_v26 }
 0x244   : > { %1984 = vmatpush1.bf16.msra.mxu0 %v2486_v36  ;;  %2016 = vmatpush1.bf16.msra.mxu1 %v2491_v38 }
 0x245   : > { %1986 = vmatprep.subr.bf16.mxu0 %v2493_v39  ;;  %2018 = vmatprep.subr.bf16.mxu1 %v2505_v45 }
 0x248   : > { %1988 = vmatpush1.bf16.msra.mxu0 %v2526_v52  ;;  %2020 = vmatpush1.bf16.msra.mxu1 %v2531_v54 }
 0x249   : > { %1990 = vmatprep.subr.bf16.mxu0 %v2533_v57  ;;  %2022 = vmatprep.subr.bf16.mxu1 %v2542_v61 }
 0x24c   : > { %1992 = vmatpush1.bf16.msra.mxu0 %v2551_v0  ;;  %2024 = vmatpush1.bf16.msra.mxu1 %v2555_v1 }
 0x302   : > { %v1233_v9 = vpop.f32.mrb[4].mxu0  ;;  %v1304_v24 = vpop.f32.mrb[4].mxu1 }
 0x303   : > { %v2029_v28 = vadd.f32 %v1233_v9, %v2599_v13  ;;  %v1235_v32 = vpop.f32.mrb[5].mxu0  ;;  %v1306_v33 = vpop.f32.mrb[5].mxu1  ;;  %v2037_v46 = vadd.f32 %v1304_v24, %v2604_v23 }
 0x304   : > { %v2030_v37 = vadd.f32 %v1235_v32, %v2601_v15  ;;  %v2038_v53 = vadd.f32 %v1306_v33, %v2608_v43 }
 0x305   : > { %v1313_v41 = vmul.f32 0.5, %v2029_v28 }
 0x306   : > { %v1317_v42 = vmul.f32 0.5, %v2030_v37  ;;  %v1322_v55 = vmul.f32 0.5, %v2038_v53 }
 0x307   : > { %2102 = vtanh.f32 %v1313_v41 }
 0x308   : > { %2104 = vtanh.f32 %v1317_v42 }
 0x309   : > { %2106 = vtanh.f32 %v2037_v46 }
 0x30a   : > { %2108 = vtanh.f32 %v1322_v55 }
 0x311   : > { %v2103_v56 = vpop.eup %2102 }
 0x312   : > { %v2105_v60 = vpop.eup %2104  ;;  %v1315_v2 = vmul.f32 0.5, %v2103_v56 }
 0x313   : > { %v1319_v4 = vmul.f32 0.5, %v2105_v60  ;;  %v2107_v10 = vpop.eup %2106 }
 0x314   : > { %v1316_v5 = vadd.f32 0.5, %v1315_v2  ;;  %v2109_v36 = vpop.eup %2108 }
 0x315   : > { %v1320_v17 = vadd.f32 0.5, %v1319_v4  ;;  %v1324_v38 = vmul.f32 0.5, %v2109_v36 }
 0x316   : > { %v1327_v18 = vmul.f32 %v2107_v10, %v1316_v5 }
 0x317   : > { %v1326_v21 = vmul.f32 %v1320_v17, %v2656_v63  ;;  %v1325_v39 = vadd.f32 0.5, %v1324_v38 }
 0x319   : > { %v1328_v26 = vadd.f32 %v1327_v18, %v1326_v21 }
 0x31b   : > { %2110 = vtanh.f32 %v1328_v26  ;;  %1756 = vst [vmem:[%s2218_s15 + $0x10] sm:$0xff] %v1328_v26 }
 0x325   : > { %v2111_v45 = vpop.eup %2110 }
 0x326   : > { %v1330_v52 = vmul.f32 %v2111_v45, %v1325_v39 }
 0x328   : > { %1755 = vst [vmem:[%s2213_s12 + $0x10] sm:$0xff] %v1330_v52  ;;  %1471 = vmatmul.mubr.f32.vlgmr.msra.gmra.mrb[6].mxu0 %v1330_v52  ;;  %1542 = vmatmul.mubr.f32.vlgmr.msra.gmra.mrb[6].mxu1 %v1330_v52 }
 0x3fb   : > { %v1472_v54 = vpop.f32.mrb[6].mxu0  ;;  %v1543_v57 = vpop.f32.mrb[6].mxu1 }
 0x3fc   : > { %v2031_v61 = vadd.f32 %v1472_v54, %v2599_v13  ;;  %v1474_v0 = vpop.f32.mrb[7].mxu0  ;;  %v1545_v1 = vpop.f32.mrb[7].mxu1  ;;  %v2039_v22 = vadd.f32 %v1543_v57, %v2604_v23 }
 0x3fd   : > { %v2032_v7 = vadd.f32 %v1474_v0, %v2601_v15  ;;  %v2040_v25 = vadd.f32 %v1545_v1, %v2608_v43 }
 0x3fe   : > { %v1552_v14 = vmul.f32 0.5, %v2031_v61 }
 0x3ff   : > { %v1556_v16 = vmul.f32 0.5, %v2032_v7  ;;  %v1561_v27 = vmul.f32 0.5, %v2040_v25 }
 0x400   : > { %2112 = vtanh.f32 %v1552_v14 }
 0x401   : > { %2114 = vtanh.f32 %v1556_v16 }
 0x402   : > { %2116 = vtanh.f32 %v2039_v22 }
 0x403   : > { %2118 = vtanh.f32 %v1561_v27 }
 0x40a   : > { %v2113_v29 = vpop.eup %2112 }
 0x40b   : > { %v2115_v30 = vpop.eup %2114  ;;  %v1554_v31 = vmul.f32 0.5, %v2113_v29 }
 0x40c   : > { %v1558_v34 = vmul.f32 0.5, %v2115_v30  ;;  %v2117_v35 = vpop.eup %2116 }
 0x40d   : > { %v1555_v13 = vadd.f32 0.5, %v1554_v31  ;;  %v2119_v23 = vpop.eup %2118 }
 0x40e   : > { %v1559_v15 = vadd.f32 0.5, %v1558_v34  ;;  %v1563_v20 = vmul.f32 0.5, %v2119_v23 }
 0x40f   : > { %v1566_v40 = vmul.f32 %v2117_v35, %v1555_v13 }
 0x410   : > { %v1565_v19 = vmul.f32 %v1559_v15, %v1328_v26  ;;  %v1564_v47 = vadd.f32 0.5, %v1563_v20 }
 0x412   : > { %v1567_v44 = vadd.f32 %v1566_v40, %v1565_v19 }
 0x414   : > { %2120 = vtanh.f32 %v1567_v44  ;;  %1758 = vst [vmem:[%s2218_s15 + $0x18] sm:$0xff] %v1567_v44  ;;  %1575 = vst [vmem:[#allocation4] sm:$0xff] %v1567_v44 }
 0x41e   : > { %v2121_v43 = vpop.eup %2120 }
 0x41f   : > { %v1569_v48 = vmul.f32 %v2121_v43, %v1564_v47 }
 0x421   : > { %1757 = vst [vmem:[%s2213_s12 + $0x18] sm:$0xff] %v1569_v48  ;;  %1574 = vst [vmem:[#allocation3] sm:$0xff] %v1569_v48 }
 0x422 PF: > { %s18_s26 = sadd.s32 1, %s2144_s26   ;;  %s2724_s24 = smov %s2140_s25 }
 0x423   : > { %p15_p6 = scmp.ge.s32.totalorder %s18_s26, 4   ;;  %s2725_s25 = smov %s2727_s27 }
 0x425   :  { %17 = sbr.rel (!%p15_p6) target bundleno = 2 (0x2), region = 106 }

</bundles_post_ra>
